<compile_context>
chip_gen: v5e
topology: v5e:2x2
jax: 0.10.0
libtpu: 0.0.40
codegen_flags: <defaults>
</compile_context>

<pallas_src>
import functools

import jax
import jax.numpy as jnp
from jax.experimental import pallas as pl
from jax.experimental.pallas import tpu as pltpu


def _round_up(x, m):
    return (x + m - 1) // m * m


# ---------------------------------------------------------------------------
# Kernel: the whole MLP for one batch tile. Intermediates never leave VMEM.
# ---------------------------------------------------------------------------
def _fused_mlp_kernel(*refs, num_layers):
    # refs = (x_ref, w0_ref, b0_ref, ..., w{L-1}_ref, b{L-1}_ref, o_ref)
    x_ref = refs[0]
    o_ref = refs[-1]

    h = x_ref[...]                                   # (tm, in_pad), compute dtype
    for layer in range(num_layers):
        w = refs[1 + 2 * layer][...]                 # (prev_pad, out_pad), compute dtype
        b = refs[2 + 2 * layer][...]                 # (1, out_pad), f32
        # MXU matmul with f32 accumulation; elementwise math in f32.
        y = jnp.dot(h, w, preferred_element_type=jnp.float32) + b
        if layer < num_layers - 1:
            # hidden layer: ReLU (dropout is identity in eval mode)
            h = jnp.maximum(y, 0.0).astype(w.dtype)  # back to compute dtype for next MXU pass
        else:
            # output layer: sigmoid (EUP), keep f32 until the final store
            h = jax.nn.sigmoid(y)
    o_ref[...] = h.astype(o_ref.dtype)


# ---------------------------------------------------------------------------
# Per-generation configuration
# ---------------------------------------------------------------------------
@functools.lru_cache(maxsize=1)
def _tpu_config():
    """Returns (vmem_limit_bytes, batch_row_multiple, force_two_grid_steps)."""
    try:
        kind = jax.devices()[0].device_kind.lower()
    except Exception:
        kind = ""
    if "v7" in kind or "7x" in kind:
        # 64 MiB physical VMEM per TC; 2 TCs per chip -> want >=2 grid steps.
        return 48 * 1024 * 1024, 256, True
    if "v6" in kind:
        # 128 MiB physical VMEM, 2x256x256 MXU.
        return 96 * 1024 * 1024, 256, False
    # v5e (and unknown/default): 128 MiB physical VMEM, 4x128x128 MXU.
    return 96 * 1024 * 1024, 128, False


@functools.lru_cache(maxsize=1)
def _single_buffer_supported():
    """Probe whether BlockSpec(pipeline_mode=pl.Buffered(1)) lowers & runs here."""
    if not hasattr(pl, "Buffered"):
        return False
    try:
        def _copy(x_ref, o_ref):
            o_ref[...] = x_ref[...]

        x = jnp.arange(8 * 128, dtype=jnp.float32).reshape(8, 128)
        spec = pl.BlockSpec((8, 128), lambda i: (0, 0), pipeline_mode=pl.Buffered(1))
        out = pl.pallas_call(
            _copy,
            out_shape=jax.ShapeDtypeStruct((8, 128), jnp.float32),
            grid=(2,),
            in_specs=[spec],
            out_specs=pl.BlockSpec((8, 128), lambda i: (0, 0)),
        )(x)
        out = jax.block_until_ready(out)
        return bool(jnp.all(out == x))
    except Exception:
        return False


def _pick_tm(batch, sub, row_mult, per_row_bytes, resident_bytes, vmem_limit,
             force_split):
    """Largest VMEM-fitting batch tile; >=2 grid steps on v7x when batch allows."""
    headroom = 4 * 1024 * 1024
    budget = vmem_limit - resident_bytes - headroom
    tm_cap = max(sub, budget // max(per_row_bytes, 1))
    b_sub = _round_up(max(batch, 1), sub)
    target = b_sub
    if force_split and b_sub >= 2 * sub:
        target = _round_up((b_sub + 1) // 2, sub)   # split so both TCs get work
    tm = min(tm_cap, target, 2048)
    if tm >= row_mult:
        tm = (tm // row_mult) * row_mult            # fill MXU rows (256 on v6e/v7x)
    else:
        tm = max(sub, (tm // sub) * sub)            # sublane-aligned small batches
    return int(tm)


# ---------------------------------------------------------------------------
# Parameter init (mimics nn.Linear default: uniform +-1/sqrt(fan_in)).
# Weights stored pre-transposed as (in_features, out_features).
# ---------------------------------------------------------------------------
def init_mlp_params(key, n_input, n_hidden, n_output):
    sizes = [n_input] + list(n_hidden) + [n_output]
    params = []
    for fan_in, fan_out in zip(sizes[:-1], sizes[1:]):
        key, kw, kb = jax.random.split(key, 3)
        bound = 1.0 / jnp.sqrt(jnp.float32(fan_in))
        w = jax.random.uniform(kw, (fan_in, fan_out), jnp.float32, -bound, bound)
        b = jax.random.uniform(kb, (fan_out,), jnp.float32, -bound, bound)
        params.append((w, b))
    return params


# ---------------------------------------------------------------------------
# Fused-forward builder: pads/casts weights ONCE, returns jitted forward(x).
# ---------------------------------------------------------------------------
def make_fused_mlp(params, drop_p=0.0, compute_dtype=jnp.bfloat16):
    """Hidden layers: Linear -> ReLU -> Dropout(identity, eval); output layer:
    Linear -> Sigmoid. Returned forward(x) yields float32 (batch, n_output)."""
    del drop_p  # TODO(synk): training-mode dropout not implemented (eval semantics)

    num_layers = len(params)
    n_in = params[0][0].shape[0]
    n_out = params[-1][0].shape[1]
    itemsize = jnp.dtype(compute_dtype).itemsize
    sub = 8 * (4 // itemsize)                        # native sublane rows (8 f32 / 16 bf16)
    in_pad = _round_up(n_in, 128)
    out_pads = [_round_up(w.shape[1], 128) for (w, _) in params]
    out_pad = out_pads[-1]
    dims = [in_pad] + out_pads

    # ---- one-time layout plumbing: lane-dense 128-padded weights / biases ----
    padded = []
    prev = in_pad
    for (w, b), op in zip(params, out_pads):
        fi, fo = w.shape
        w_p = jnp.zeros((prev, op), compute_dtype).at[:fi, :fo].set(
            w.astype(compute_dtype))
        b_p = jnp.zeros((1, op), jnp.float32).at[0, :fo].set(b.astype(jnp.float32))
        padded.extend([w_p, b_p])
        prev = op
    padded = tuple(jax.device_put(p) for p in padded)

    vmem_limit, row_mult, force_split = _tpu_config()
    single_buf = _single_buffer_supported()
    wb_buffers = 1 if single_buf else 2
    wb_pipeline = dict(pipeline_mode=pl.Buffered(1)) if single_buf else {}

    resident_bytes = wb_buffers * sum(
        a * b * itemsize + b * 4 for a, b in zip(dims[:-1], dims[1:]))
    if resident_bytes > int(0.75 * vmem_limit):
        # TODO(synk): K/N-tiled fallback for weights that do not fit resident in VMEM.
        raise NotImplementedError("MLP weights too large to keep resident in VMEM")

    # per batch-row VMEM bytes: double-buffered x / out tiles + f32 intermediates
    per_row_bytes = (2 * in_pad * itemsize + 2 * out_pad * itemsize
                     + 4 * sum(out_pads))

    def _forward(x, *wb):
        B = x.shape[0]
        tm = _pick_tm(B, sub, row_mult, per_row_bytes, resident_bytes,
                      vmem_limit, force_split)
        B_pad = _round_up(B, tm)
        grid = (B_pad // tm,)

        x_p = jnp.zeros((B_pad, in_pad), compute_dtype).at[:B, :n_in].set(
            x.astype(compute_dtype))

        # x / out tiled over batch; weights & biases resident (constant blocks,
        # single-buffered when supported).
        in_specs = [pl.BlockSpec((tm, in_pad), lambda i: (i, 0))]
        prev_d = in_pad
        for op in out_pads:
            in_specs.append(pl.BlockSpec((prev_d, op), lambda i: (0, 0), **wb_pipeline))
            in_specs.append(pl.BlockSpec((1, op), lambda i: (0, 0), **wb_pipeline))
            prev_d = op
        out_spec = pl.BlockSpec((tm, out_pad), lambda i: (i, 0))

        # Advisory cost estimate: what the kernel actually moves / computes.
        flops = 2 * B_pad * sum(a * b for a, b in zip(dims[:-1], dims[1:]))
        bytes_accessed = (
            B_pad * in_pad * itemsize                                  # x read once
            + sum(a * b * itemsize + b * 4
                  for a, b in zip(dims[:-1], dims[1:]))                # weights + bias
            + B_pad * out_pad * itemsize)                              # output written

        kernel = functools.partial(_fused_mlp_kernel, num_layers=num_layers)
        out = pl.pallas_call(
            kernel,
            out_shape=jax.ShapeDtypeStruct((B_pad, out_pad), compute_dtype),
            grid_spec=pltpu.PrefetchScalarGridSpec(
                num_scalar_prefetch=0,
                grid=grid,
                in_specs=in_specs,
                out_specs=out_spec,
            ),
            compiler_params=pltpu.CompilerParams(
                dimension_semantics=("parallel",),   # batch tiles shard across TCs
                vmem_limit_bytes=vmem_limit,
            ),
            cost_estimate=pl.CostEstimate(
                flops=flops,
                transcendentals=B_pad * out_pad,
                bytes_accessed=bytes_accessed,
            ),
        )(x_p, *wb)
        return out[:B, :n_out].astype(jnp.float32)

    jitted = jax.jit(_forward)
    return lambda x: jitted(x, *padded)


if __name__ == "__main__":
    # Small shapes consistent with the module
    batch = 8
    n_input = 32
    n_hidden = [64, 32]
    n_output = 4
    drop_p = 0.5

    key = jax.random.PRNGKey(0)
    key, kx = jax.random.split(key)
    x = jax.random.normal(kx, (batch, n_input), jnp.float32)
    params = init_mlp_params(key, n_input, n_hidden, n_output)

    # Plain-JAX f32 reference (eval-mode dropout == identity)
    ref = x
    for (w, b) in params[:-1]:
        ref = jnp.maximum(ref @ w + b, 0.0)
    w, b = params[-1]
    ref = jax.nn.sigmoid(ref @ w + b)

    # Default bf16-MXU fused path
    fwd = make_fused_mlp(params, drop_p=drop_p, compute_dtype=jnp.bfloat16)
    out = jax.block_until_ready(fwd(x))
    assert out.shape == (batch, n_output)
    assert jnp.allclose(out, ref, atol=2e-2, rtol=2e-2), jnp.max(jnp.abs(out - ref))

    # f32 escape hatch for parity with an fp32 PyTorch MLP
    fwd32 = make_fused_mlp(params, drop_p=drop_p, compute_dtype=jnp.float32)
    out32 = jax.block_until_ready(fwd32(x))
    assert out32.shape == (batch, n_output)
    assert jnp.allclose(out32, ref, atol=1e-2, rtol=1e-2), jnp.max(jnp.abs(out32 - ref))

    print("KERNEL_OK")
</pallas_src>

<mosaic_0001>
module attributes {stable_mosaic.version = 11 : i64} {
  func.func @_copy(%arg0: i32, %arg1: memref<8x128xf32, #tpu.memory_space<vmem>>, %arg2: memref<8x128xf32, #tpu.memory_space<vmem>>) attributes {dimension_semantics = [#tpu.dimension_semantics<arbitrary>], iteration_bounds = array<i64: 2>, scalar_prefetch = 0 : i64, scratch_operands = 0 : i64, tpu.core_type = #tpu.core_type<tc>, window_params = [{pipeline_mode = #tpu.pipeline_mode<synchronous>, transform_indices = @transform_0, window_bounds = array<i64: 8, 128>}, {pipeline_mode = #tpu.pipeline_mode<synchronous>, transform_indices = @transform_1, window_bounds = array<i64: 8, 128>}]} {
    %c0 = arith.constant 0 : index
    %c0_0 = arith.constant 0 : index
    %0 = vector.load %arg1[%c0, %c0_0] : memref<8x128xf32, #tpu.memory_space<vmem>>, vector<8x128xf32>
    %c0_1 = arith.constant 0 : index
    %c0_2 = arith.constant 0 : index
    %1 = vector.load %arg2[%c0_1, %c0_2] : memref<8x128xf32, #tpu.memory_space<vmem>>, vector<8x128xf32>
    tpu.vector_store %arg2[%c0_1, %c0_2], %0 {strides = array<i32>} : memref<8x128xf32, #tpu.memory_space<vmem>>, vector<8x128xf32>,
    return
  }
  func.func @transform_0(%arg0: i32) -> (i32, i32) {
    %c0_i32 = arith.constant 0 : i32
    %c0_i32_0 = arith.constant 0 : i32
    %c0_i32_1 = arith.constant 0 : i32
    return %c0_i32, %c0_i32_0 : i32, i32
  }
  func.func @transform_1(%arg0: i32) -> (i32, i32) {
    %c0_i32 = arith.constant 0 : i32
    %c0_i32_0 = arith.constant 0 : i32
    %c0_i32_1 = arith.constant 0 : i32
    return %c0_i32, %c0_i32_0 : i32, i32
  }
}

module attributes {stable_mosaic.version = 11 : i64} {
  func.func @_fused_mlp_kernel(%arg0: i32, %arg1: memref<16x128xbf16, #tpu.memory_space<vmem>>, %arg2: memref<128x128xbf16, #tpu.memory_space<vmem>>, %arg3: memref<1x128xf32, #tpu.memory_space<vmem>>, %arg4: memref<128x128xbf16, #tpu.memory_space<vmem>>, %arg5: memref<1x128xf32, #tpu.memory_space<vmem>>, %arg6: memref<128x128xbf16, #tpu.memory_space<vmem>>, %arg7: memref<1x128xf32, #tpu.memory_space<vmem>>, %arg8: memref<16x128xbf16, #tpu.memory_space<vmem>>) attributes {dimension_semantics = [#tpu.dimension_semantics<parallel>], iteration_bounds = array<i64: 1>, scalar_prefetch = 0 : i64, scratch_operands = 0 : i64, tpu.core_type = #tpu.core_type<tc>, window_params = [{transform_indices = @transform_0, window_bounds = array<i64: 16, 128>}, {pipeline_mode = #tpu.pipeline_mode<synchronous>, transform_indices = @transform_1, window_bounds = array<i64: 128, 128>}, {pipeline_mode = #tpu.pipeline_mode<synchronous>, transform_indices = @transform_2, window_bounds = array<i64: 1, 128>}, {pipeline_mode = #tpu.pipeline_mode<synchronous>, transform_indices = @transform_3, window_bounds = array<i64: 128, 128>}, {pipeline_mode = #tpu.pipeline_mode<synchronous>, transform_indices = @transform_4, window_bounds = array<i64: 1, 128>}, {pipeline_mode = #tpu.pipeline_mode<synchronous>, transform_indices = @transform_5, window_bounds = array<i64: 128, 128>}, {pipeline_mode = #tpu.pipeline_mode<synchronous>, transform_indices = @transform_6, window_bounds = array<i64: 1, 128>}, {transform_indices = @transform_7, window_bounds = array<i64: 16, 128>}]} {
    %c0 = arith.constant 0 : index
    %c0_0 = arith.constant 0 : index
    %0 = vector.load %arg1[%c0, %c0_0] : memref<16x128xbf16, #tpu.memory_space<vmem>>, vector<16x128xbf16>
    %c0_1 = arith.constant 0 : index
    %c0_2 = arith.constant 0 : index
    %1 = vector.load %arg2[%c0_1, %c0_2] : memref<128x128xbf16, #tpu.memory_space<vmem>>, vector<128x128xbf16>
    %c0_3 = arith.constant 0 : index
    %c0_4 = arith.constant 0 : index
    %2 = vector.load %arg3[%c0_3, %c0_4] : memref<1x128xf32, #tpu.memory_space<vmem>>, vector<1x128xf32>
    %cst = arith.constant dense<0.000000e+00> : vector<16x128xf32>
    %3 = tpu.matmul %0, %1, %cst {dimension_numbers = #tpu.dot_dimension_numbers<[1], [0], [0], [1], [0, 0, 1, 1], [], []>} : vector<16x128xbf16>, vector<128x128xbf16>, vector<16x128xf32> -> vector<16x128xf32>
    %4 = vector.broadcast %2 : vector<1x128xf32> to vector<16x128xf32>
    %5 = arith.addf %3, %4 : vector<16x128xf32>
    %cst_5 = arith.constant 0.000000e+00 : f32
    %6 = vector.broadcast %cst_5 : f32 to vector<16x128xf32>
    %7 = arith.maximumf %5, %6 : vector<16x128xf32>
    %8 = arith.truncf %7 : vector<16x128xf32> to vector<16x128xbf16>
    %c0_6 = arith.constant 0 : index
    %c0_7 = arith.constant 0 : index
    %9 = vector.load %arg4[%c0_6, %c0_7] : memref<128x128xbf16, #tpu.memory_space<vmem>>, vector<128x128xbf16>
    %c0_8 = arith.constant 0 : index
    %c0_9 = arith.constant 0 : index
    %10 = vector.load %arg5[%c0_8, %c0_9] : memref<1x128xf32, #tpu.memory_space<vmem>>, vector<1x128xf32>
    %cst_10 = arith.constant dense<0.000000e+00> : vector<16x128xf32>
    %11 = tpu.matmul %8, %9, %cst_10 {dimension_numbers = #tpu.dot_dimension_numbers<[1], [0], [0], [1], [0, 0, 1, 1], [], []>} : vector<16x128xbf16>, vector<128x128xbf16>, vector<16x128xf32> -> vector<16x128xf32>
    %12 = vector.broadcast %10 : vector<1x128xf32> to vector<16x128xf32>
    %13 = arith.addf %11, %12 : vector<16x128xf32>
    %cst_11 = arith.constant 0.000000e+00 : f32
    %14 = vector.broadcast %cst_11 : f32 to vector<16x128xf32>
    %15 = arith.maximumf %13, %14 : vector<16x128xf32>
    %16 = arith.truncf %15 : vector<16x128xf32> to vector<16x128xbf16>
    %c0_12 = arith.constant 0 : index
    %c0_13 = arith.constant 0 : index
    %17 = vector.load %arg6[%c0_12, %c0_13] : memref<128x128xbf16, #tpu.memory_space<vmem>>, vector<128x128xbf16>
    %c0_14 = arith.constant 0 : index
    %c0_15 = arith.constant 0 : index
    %18 = vector.load %arg7[%c0_14, %c0_15] : memref<1x128xf32, #tpu.memory_space<vmem>>, vector<1x128xf32>
    %cst_16 = arith.constant dense<0.000000e+00> : vector<16x128xf32>
    %19 = tpu.matmul %16, %17, %cst_16 {dimension_numbers = #tpu.dot_dimension_numbers<[1], [0], [0], [1], [0, 0, 1, 1], [], []>} : vector<16x128xbf16>, vector<128x128xbf16>, vector<16x128xf32> -> vector<16x128xf32>
    %20 = vector.broadcast %18 : vector<1x128xf32> to vector<16x128xf32>
    %21 = arith.addf %19, %20 : vector<16x128xf32>
    %22 = arith.negf %21 : vector<16x128xf32>
    %23 = math.exp %22 : vector<16x128xf32>
    %cst_17 = arith.constant 1.000000e+00 : f32
    %24 = vector.broadcast %cst_17 : f32 to vector<16x128xf32>
    %25 = arith.addf %24, %23 : vector<16x128xf32>
    %26 = arith.divf %24, %25 : vector<16x128xf32>
    %27 = arith.truncf %26 : vector<16x128xf32> to vector<16x128xbf16>
    %c0_18 = arith.constant 0 : index
    %c0_19 = arith.constant 0 : index
    %28 = vector.load %arg8[%c0_18, %c0_19] : memref<16x128xbf16, #tpu.memory_space<vmem>>, vector<16x128xbf16>
    tpu.vector_store %arg8[%c0_18, %c0_19], %27 {strides = array<i32>} : memref<16x128xbf16, #tpu.memory_space<vmem>>, vector<16x128xbf16>,
    return
  }
  func.func @transform_0(%arg0: i32) -> (i32, i32) {
    %c0_i32 = arith.constant 0 : i32
    %c0_i32_0 = arith.constant 0 : i32
    return %arg0, %c0_i32 : i32, i32
  }
  func.func @transform_1(%arg0: i32) -> (i32, i32) {
    %c0_i32 = arith.constant 0 : i32
    %c0_i32_0 = arith.constant 0 : i32
    %c0_i32_1 = arith.constant 0 : i32
    return %c0_i32, %c0_i32_0 : i32, i32
  }
  func.func @transform_2(%arg0: i32) -> (i32, i32) {
    %c0_i32 = arith.constant 0 : i32
    %c0_i32_0 = arith.constant 0 : i32
    %c0_i32_1 = arith.constant 0 : i32
    return %c0_i32, %c0_i32_0 : i32, i32
  }
  func.func @transform_3(%arg0: i32) -> (i32, i32) {
    %c0_i32 = arith.constant 0 : i32
    %c0_i32_0 = arith.constant 0 : i32
    %c0_i32_1 = arith.constant 0 : i32
    return %c0_i32, %c0_i32_0 : i32, i32
  }
  func.func @transform_4(%arg0: i32) -> (i32, i32) {
    %c0_i32 = arith.constant 0 : i32
    %c0_i32_0 = arith.constant 0 : i32
    %c0_i32_1 = arith.constant 0 : i32
    return %c0_i32, %c0_i32_0 : i32, i32
  }
  func.func @transform_5(%arg0: i32) -> (i32, i32) {
    %c0_i32 = arith.constant 0 : i32
    %c0_i32_0 = arith.constant 0 : i32
    %c0_i32_1 = arith.constant 0 : i32
    return %c0_i32, %c0_i32_0 : i32, i32
  }
  func.func @transform_6(%arg0: i32) -> (i32, i32) {
    %c0_i32 = arith.constant 0 : i32
    %c0_i32_0 = arith.constant 0 : i32
    %c0_i32_1 = arith.constant 0 : i32
    return %c0_i32, %c0_i32_0 : i32, i32
  }
  func.func @transform_7(%arg0: i32) -> (i32, i32) {
    %c0_i32 = arith.constant 0 : i32
    %c0_i32_0 = arith.constant 0 : i32
    return %arg0, %c0_i32 : i32, i32
  }
}

</mosaic_0001>

<bundles_post_ra>
// kernel: tpu_custom_call.1
= control target key start
LH: loop header
LB: loop body
LE: loop exit
PB: predicated region body
PF: predicated region fallthrough
CT: control target
= control target key end

     0   :  { %6 = vsyncpa [#allocation3], 0  ;;  %s286_s0 = inlined_call_operand.hbm [shape: f32[8,128], index: 0, kind: input, shape index: {}]   ;;  %s287_s1 = inlined_call_operand.hbm [shape: f32[8,128], index: 1, kind: output, shape index: {}]  }
   0x1   :  { %7 = vsyncpa [#allocation4], 0  ;;  %s269_s6 = smov 0  }
   0x2 LB: > { %s148_s7 = sadd.s32 4294967295, %s255_s6   ;;  %p149_p0 = scmp.ge.s32.totalorder %s255_s6, 1  ;;  %s255_s6 = sphi %s269_s6, %s13_s6  }
   0x3   : > { %p60_p1 = scmp.lt.s32.totalorder %s255_s6, 3  ;;  %s72_s10 = sshll.u32 %s286_s0, 4  ;;  %s73_s10 = int_to_ptr.hbm [resolvable:$true] %s72_s10 }
   0x4   : > { %p169_p3 = scmp.eq.s32.totalorder %s148_s7, 0  ;;  %s257_s11 = smov [#allocation2]  }
   0x5   : > { %p61_p2 = pnand %p149_p0, %p60_p1  ;;  %s74_s12 = sshll.u32 %s257_s11, 4  ;;  %s75_s12 = int_to_ptr.vmem [resolvable:$true] %s74_s12 }
   0x7   : > { %p165_p4 = pneg %p61_p2  ;;  %87 = sbr.rel (%p61_p2) target bundleno = 19 (0x13), region = 24 }
   0x9   : > { %p166_p5 = pnand %p169_p3, %p165_p4 }
   0xb   : > { %168 = dma.hbm_to_vmem [thread:$0]  (!%p166_p5), %s73_s10, 128, %s75_s12, [#allocation3]  }
   0xc   : > { %246 = dma.done.wait (%p169_p3), [#allocation3], 128  }
   0xd   : > { %248 = vsyncadd (%p169_p3), [#allocation3], 4294967168  ;;  %s258_s13 = smov [#allocation5]   ;;  %s108_s17 = sshll.u32 %s287_s1, 4  ;;  %v98_v0 = vld [vmem:[#allocation2] sm:$0xff]  ;;  %s109_s17 = int_to_ptr.hbm [resolvable:$true] %s108_s17 }
   0xe   : > { %s106_s14 = sshll.u32 %s258_s13, 4  ;;  %p171_p6 = scmp.eq.s32.totalorder %s148_s7, 1  ;;  %99 = vst [vmem:[#allocation5] sm:$0xff] %v98_v0  ;;  %s107_s14 = int_to_ptr.vmem [resolvable:$true] %s106_s14 }
  0x10   : > { %162 = dma.vmem_to_hbm [thread:$0]  (%p171_p6), %s107_s14, 128, %s109_s17, [#allocation4]  }
  0x11   : > { %250 = dma.done.wait (%p171_p6), [#allocation4], 128  }
  0x12   : > { %252 = vsyncadd (%p171_p6), [#allocation4], 4294967168 }
  0x13 PF: > { %s13_s6 = sadd.s32 1, %s255_s6  }
  0x14   : > { %p10_p7 = scmp.ge.s32.totalorder %s13_s6, 4  }
  0x16   :  { %12 = sbr.rel (!%p10_p7) target bundleno = 2 (0x2), region = 53 }
  0x1b   :  { %122 = vsyncpa [#allocation3], 1 }
  0x1c   :  { %124 = vsyncpa [#allocation3 + $0x1], 1 }
  0x1d   :  { %125 = vsyncpa [#allocation4], 1 }
  0x1e   :  { %127 = vsyncpa [#allocation4 + $0x1], 1 }

// kernel: _forward.1
= control target key start
LH: loop header
LB: loop body
LE: loop exit
PB: predicated region body
PF: predicated region fallthrough
CT: control target
= control target key end

     0   :  { %12 = vsyncpa [#allocation3], 0  ;;  %s674_s0 = inlined_call_operand.vmem [shape: bf16[16,128], index: 0, kind: input, shape index: {}]   ;;  %s675_s1 = inlined_call_operand.hbm [shape: bf16[128,128], index: 1, kind: input, shape index: {}]   ;;  %s676_s2 = inlined_call_operand.vmem [shape: f32[1,128], index: 2, kind: input, shape index: {}]   ;;  %s677_s3 = inlined_call_operand.hbm [shape: bf16[128,128], index: 3, kind: input, shape index: {}]   ;;  %s678_s4 = inlined_call_operand.vmem [shape: f32[1,128], index: 4, kind: input, shape index: {}]   ;;  %s679_s5 = inlined_call_operand.hbm [shape: bf16[128,128], index: 5, kind: input, shape index: {}]   ;;  %s680_s6 = inlined_call_operand.vmem [shape: f32[1,128], index: 6, kind: input, shape index: {}]   ;;  %s681_s7 = inlined_call_operand.vmem [shape: bf16[16,128], index: 7, kind: output, shape index: {}]  }
   0x1   :  { %13 = vsyncpa [#allocation5], 0  ;;  %s35_s26 = sshll.u32 %s677_s3, 4  ;;  %s605_s27 = smov [#allocation4]   ;;  %s36_s26 = int_to_ptr.hbm [resolvable:$true] %s35_s26 }
   0x2   :  { %s37_s28 = sshll.u32 %s605_s27, 4  ;;  %s20_s8 = sshll.u32 %s675_s1, 4  ;;  %s38_s28 = int_to_ptr.vmem [resolvable:$true] %s37_s28  ;;  %s21_s8 = int_to_ptr.hbm [resolvable:$true] %s20_s8 }
   0x3   :  { %s606_s9 = smov 64   ;;  %s607_s10 = smov 4  }
   0x4   :  { %43 = dma.hbm_to_vmem [thread:$0]  %s36_s26, 1024, %s38_s28, [#allocation5], %s606_s9, %s606_s9, %s607_s10  }
   0x5   :  { %s608_s11 = smov [#allocation2]   ;;  %s50_s15 = sshll.u32 %s679_s5, 4  ;;  %s51_s15 = int_to_ptr.hbm [resolvable:$true] %s50_s15 }
   0x6   :  { %s22_s12 = sshll.u32 %s608_s11, 4  ;;  %s609_s3 = smov [#allocation6]   ;;  %s23_s12 = int_to_ptr.vmem [resolvable:$true] %s22_s12 }
   0x7   :  { %28 = dma.hbm_to_vmem [thread:$0]  %s21_s8, 1024, %s23_s12, [#allocation3], %s606_s9, %s606_s9, %s607_s10  }
   0x8   :  { %s52_s16 = sshll.u32 %s609_s3, 4  ;;  %s53_s16 = int_to_ptr.vmem [resolvable:$true] %s52_s16 }
   0x9   :  { %58 = dma.hbm_to_vmem [thread:$0]  %s51_s15, 1024, %s53_s16, [#allocation5], %s606_s9, %s606_s9, %s607_s10  }
   0xa   :  { %601 = dma.done.wait [#allocation3], 1024  }
   0xb   :  { %602 = vsyncadd [#allocation3], 4294966272 }
   0xc   :  { %603 = dma.done.wait [#allocation5], 2048  }
   0xd   :  { %604 = vsyncadd [#allocation5], 4294965248  ;;  %v491_v0 = vld [vmem:[#allocation2 + $0x38] sm:$0xff]  ;;  %v490_v1 = vld [vmem:[#allocation2 + $0x30] sm:$0xff] }
   0xe   :  { %149 = vmatpush.bf16.msra.mxu0 %v491_v0  ;;  %v499_v2 = vld [vmem:[#allocation4 + $0x38] sm:$0xff]  ;;  %v498_v3 = vld [vmem:[#allocation4 + $0x30] sm:$0xff]  ;;  %v489_v4 = vld [vmem:[#allocation2 + $0x28] sm:$0xff] }
   0xf   :  { %234 = vmatpush.bf16.msra.mxu1 %v499_v2  ;;  %v497_v5 = vld [vmem:[#allocation4 + $0x28] sm:$0xff]  ;;  %v488_v6 = vld [vmem:[#allocation2 + $0x20] sm:$0xff]  ;;  %v487_v8 = vld [vmem:[#allocation2 + $0x18] sm:$0xff] }
  0x10   :  { %v496_v7 = vld [vmem:[#allocation4 + $0x20] sm:$0xff]  ;;  %v486_v9 = vld [vmem:[#allocation2 + $0x10] sm:$0xff]  ;;  %v485_v10 = vld [vmem:[#allocation2 + $0x8] sm:$0xff] }
  0x11   :  { %v484_v11 = vld [vmem:[#allocation2] sm:$0xff]  ;;  %v495_v13 = vld [vmem:[#allocation4 + $0x18] sm:$0xff]  ;;  %v494_v14 = vld [vmem:[#allocation4 + $0x10] sm:$0xff] }
  0x12   :  { %150 = vmatpush.bf16.msra.mxu0 %v490_v1  ;;  %v483_v12 = vld [vmem:[%s674_s0] sm:$0xff]  ;;  %v493_v15 = vld [vmem:[#allocation4 + $0x8] sm:$0xff]  ;;  %v507_v17 = vld [vmem:[#allocation6 + $0x38] sm:$0xff] }
  0x13   :  { %235 = vmatpush.bf16.msra.mxu1 %v498_v3  ;;  %v492_v16 = vld [vmem:[#allocation4] sm:$0xff]  ;;  %319 = vmatpush.bf16.msra.mxu2 %v507_v17  ;;  %v506_v18 = vld [vmem:[#allocation6 + $0x30] sm:$0xff]  ;;  %v505_v19 = vld [vmem:[#allocation6 + $0x28] sm:$0xff] }
  0x14   :  { %v504_v20 = vld [vmem:[#allocation6 + $0x20] sm:$0xff]  ;;  %v503_v29 = vld [vmem:[#allocation6 + $0x18] sm:$0xff]  ;;  %v502_v30 = vld [vmem:[#allocation6 + $0x10] sm:$0xff] }
  0x15   :  { %v518_v22 = vld [vmem:[%s676_s2] ss:$0 sm:$0xff]  ;;  %v501_v31 = vld [vmem:[#allocation6 + $0x8] sm:$0xff] }
  0x16   :  { %151 = vmatpush.bf16.msra.mxu0 %v489_v4  ;;  %v500_v32 = vld [vmem:[#allocation6] sm:$0xff] }
  0x17   :  { %236 = vmatpush.bf16.msra.mxu1 %v497_v5  ;;  %320 = vmatpush.bf16.msra.mxu2 %v506_v18  ;;  %v519_v34 = vld [vmem:[%s678_s4] ss:$0 sm:$0xff] }
  0x18   :  { %v520_v41 = vld [vmem:[%s680_s6] ss:$0 sm:$0xff] }
  0x1a   :  { %152 = vmatpush.bf16.msra.mxu0 %v488_v6 }
  0x1b   :  { %237 = vmatpush.bf16.msra.mxu1 %v496_v7  ;;  %321 = vmatpush.bf16.msra.mxu2 %v505_v19 }
  0x1e   :  { %153 = vmatpush.bf16.msra.mxu0 %v487_v8 }
  0x1f   :  { %238 = vmatpush.bf16.msra.mxu1 %v495_v13  ;;  %322 = vmatpush.bf16.msra.mxu2 %v504_v20 }
  0x22   :  { %154 = vmatpush.bf16.msra.mxu0 %v486_v9 }
  0x23   :  { %239 = vmatpush.bf16.msra.mxu1 %v494_v14  ;;  %323 = vmatpush.bf16.msra.mxu2 %v503_v29 }
  0x26   :  { %155 = vmatpush.bf16.msra.mxu0 %v485_v10 }
  0x27   :  { %240 = vmatpush.bf16.msra.mxu1 %v493_v15  ;;  %324 = vmatpush.bf16.msra.mxu2 %v502_v30 }
  0x2a   :  { %156 = vmatpush.bf16.msra.mxu0 %v484_v11 }
  0x2b   :  { %241 = vmatpush.bf16.msra.mxu1 %v492_v16  ;;  %325 = vmatpush.bf16.msra.mxu2 %v501_v31 }
  0x2d   :  { %157 = vmatmul.bf16.vlgmr.msra.gmra.mxu0 %v483_v12 }
  0x2f   :  { %326 = vmatpush.bf16.msra.mxu2 %v500_v32 }
  0xaa   :  { %v158_v21 = vpop.f32.mrf.mxu0 }
  0xab   :  { %v159_v23 = vadd.f32 %v518_v22, %v158_v21 }
  0xad   :  { %v163_v26 = vmax.f32 %v159_v23, 0.0 }
  0xb2   :  { %v160_v24 = vpop.f32.mrf.mxu0 }
  0xb3   :  { %v161_v25 = vadd.f32 %v518_v22, %v160_v24 }
  0xb5   :  { %v164_v27 = vmax.f32 %v161_v25, 0.0 }
  0xb7   :  { %v165_v28 = vpack.c.bf16 %v164_v27, %v163_v26 }
  0xb9   :  { %242 = vmatmul.bf16.vlgmr.msra.gmra.mxu1 %v165_v28 }
 0x136   :  { %v243_v33 = vpop.f32.mrf.mxu1 }
 0x137   :  { %v244_v35 = vadd.f32 %v519_v34, %v243_v33 }
 0x139   :  { %v248_v38 = vmax.f32 %v244_v35, 0.0 }
 0x13e   :  { %v245_v36 = vpop.f32.mrf.mxu1 }
 0x13f   :  { %v246_v37 = vadd.f32 %v519_v34, %v245_v36 }
 0x141   :  { %v249_v39 = vmax.f32 %v246_v37, 0.0 }
 0x143   :  { %v250_v40 = vpack.c.bf16 %v249_v39, %v248_v38 }
 0x145   :  { %327 = vmatmul.bf16.vlgmr.msra.gmra.mxu2 %v250_v40 }
 0x1c8   :  { %v328_v42 = vpop.f32.mrf.mxu2 }
 0x1c9   :  { %v329_v43 = vadd.f32 %v520_v41, %v328_v42 }
 0x1cb   :  { %v481_v44 = vmul.f32 -1.442695, %v329_v43 }
 0x1cd   :  { %521 = vpow2.f32 %v481_v44 }
 0x1d0   :  { %v330_v45 = vpop.f32.mrf.mxu2 }
 0x1d1   :  { %v331_v46 = vadd.f32 %v520_v41, %v330_v45 }
 0x1d3   :  { %v522_v47 = vpop.eup %521  ;;  %v482_v48 = vmul.f32 -1.442695, %v331_v46 }
 0x1d4   :  { %v339_v49 = vadd.f32 1.0, %v522_v47 }
 0x1d5   :  { %523 = vpow2.f32 %v482_v48 }
 0x1d6   :  { %525 = vrcp.f32 %v339_v49  ;;  %vm346_vm1 = vweird.f32 %v339_v49  ;;  %v352_v60 = vand.u32 2147483648, %v339_v49  ;;  %v350_v62 = vand.u32 2147483647, %v339_v49 }
 0x1d8   :  { %v353_v3 = vor.u32 1.1754944e-38, %v352_v60  ;;  %vm351_vm6 = vcmp.eq.f32.partialorder %v350_v62, 8.507059e+37 }
 0x1db   :  { %v524_v50 = vpop.eup %523 }
 0x1dc   :  { %v526_v51 = vpop.eup %525  ;;  %v340_v52 = vadd.f32 1.0, %v524_v50 }
 0x1dd   :  { %v342_v53 = vmul.f32 %v526_v51, %v339_v49  ;;  %vm347_vm0 = vweird.f32 %v526_v51 }
 0x1de   :  { %527 = vrcp.f32 %v340_v52  ;;  %v367_v61 = vand.u32 2147483648, %v340_v52  ;;  %v365_v0 = vand.u32 2147483647, %v340_v52  ;;  %vm348_vm3 = vmor %vm346_vm1, %vm347_vm0  ;;  %vm361_vm4 = vweird.f32 %v340_v52 }
 0x1df   :  { %v343_v54 = vsub.f32 1.0, %v342_v53 }
 0x1e0   :  { %v368_v4 = vor.u32 1.1754944e-38, %v367_v61  ;;  %vm366_vm7 = vcmp.eq.f32.partialorder %v365_v0, 8.507059e+37 }
 0x1e1   :  { %v344_v55 = vmul.f32 %v526_v51, %v343_v54 }
 0x1e3   :  { %v345_v58 = vadd.f32 %v526_v51, %v344_v55 }
 0x1e4   :  { %v528_v56 = vpop.eup %527 }
 0x1e5   :  { %v357_v57 = vmul.f32 %v528_v56, %v340_v52  ;;  %vm362_vm2 = vweird.f32 %v528_v56  ;;  %v349_v1 = vsel %vm348_vm3, %v526_v51, %v345_v58 }
 0x1e6   :  { %vm363_vm5 = vmor %vm361_vm4, %vm362_vm2  ;;  %v354_v6 = vsel %vm351_vm6, %v353_v3, %v349_v1 }
 0x1e7   :  { %v358_v59 = vsub.f32 1.0, %v357_v57 }
 0x1e9   :  { %v359_v63 = vmul.f32 %v528_v56, %v358_v59 }
 0x1eb   :  { %v360_v2 = vadd.f32 %v528_v56, %v359_v63 }
 0x1ed   :  { %v364_v5 = vsel %vm363_vm5, %v528_v56, %v360_v2 }
 0x1ee   :  { %v369_v7 = vsel %vm366_vm7, %v368_v4, %v364_v5 }
 0x1ef   :  { %v511_v8 = vpack.c.bf16 %v369_v7, %v354_v6 }
 0x1f1   :  { %512 = vst [vmem:[%s681_s7] sm:$0xff] %v511_v8  }
 0x1f2   :  { %379 = vsyncpa [#allocation3], 1 }
 0x1f3   :  { %380 = vsyncpa [#allocation5], 1 }

</bundles_post_ra>
